<compile_context>
chip_gen: v5e
topology: v5e:2x2
jax: 0.10.0
libtpu: 0.0.40
codegen_flags: <defaults>
</compile_context>

<pallas_src>
import jax
import jax.numpy as jnp
from jax.experimental import pallas as pl
from jax.experimental.pallas import tpu as pltpu

_SUBLANE = 8
_TB_CAP = 512          # max rows per grid step (85%+ of HBM roofline territory)


def _round_up(v, m):
    return (v + m - 1) // m * m


def _mlp_kernel(x_ref, w1_ref, b1_ref, w2_ref, b2_ref, w3_ref, b3_ref, out_ref):
    # Layer 1: Linear(n_input -> 128) + ReLU. K is tiny (e.g. 4); the MXU
    # handles the narrow contraction directly — no in-kernel padding needed.
    h1 = jnp.dot(x_ref[...], w1_ref[...], preferred_element_type=jnp.float32)
    h1 = jnp.maximum(h1 + b1_ref[...], 0.0)
    # Layer 2: Linear(128 -> 128) + ReLU.
    h2 = jnp.dot(h1, w2_ref[...], preferred_element_type=jnp.float32)
    h2 = jnp.maximum(h2 + b2_ref[...], 0.0)
    # Layer 3: Linear(128 -> n_output). Output block is narrow (n_output lanes);
    # masked stores for a handful of lanes are far cheaper than 128-wide HBM
    # writeback + a wrapper slice.
    q = jnp.dot(h2, w3_ref[...], preferred_element_type=jnp.float32)
    out_ref[...] = (q + b3_ref[...]).astype(out_ref.dtype)


@jax.jit
def qnetwork2_forward(x, w1, b1, w2, b2, w3, b3):
    """Fused forward pass of Qnetwork2 (semantics of the nn.Sequential spec)."""
    x = x.astype(jnp.float32)
    batch, n_input = x.shape
    hidden = w1.shape[1]          # 128
    n_output = w3.shape[1]

    # Accept PyTorch-style (out,) bias vectors or (1, out) rows.
    b1 = b1.reshape(1, hidden).astype(jnp.float32)
    b2 = b2.reshape(1, hidden).astype(jnp.float32)
    b3 = b3.reshape(1, n_output).astype(jnp.float32)

    if batch <= _TB_CAP:
        # Single block covering the whole array: block dims == array dims, so no
        # row padding is required even for odd batch sizes (e.g. batch=1).
        x_in, batch_pad, tb, nb = x, batch, batch, 1
    else:
        # Pad rows to the sublane multiple only; split into >=2 near-equal
        # 8-aligned tiles so both v7x TensorCores get balanced work. Pallas
        # handles the ragged last block (masked boundary), so batch is NOT
        # rounded up to a multiple of tb.
        batch_pad = _round_up(batch, _SUBLANE)
        x_in = x if batch_pad == batch else jnp.pad(x, ((0, batch_pad - batch), (0, 0)))
        nb = max(2, pl.cdiv(batch_pad, _TB_CAP))
        tb = _round_up(pl.cdiv(batch_pad, nb), _SUBLANE)
        nb = pl.cdiv(batch_pad, tb)

    flops = 2 * batch_pad * (n_input * hidden + hidden * hidden + hidden * n_output)
    bytes_accessed = 4 * (
        x_in.size + w1.size + b1.size + w2.size + b2.size + w3.size + b3.size
        + batch_pad * n_output
    )

    out = pl.pallas_call(
        _mlp_kernel,
        out_shape=jax.ShapeDtypeStruct((batch_pad, n_output), jnp.float32),
        grid=(nb,),
        in_specs=[
            pl.BlockSpec((tb, n_input), lambda i: (i, 0)),       # x tile (streamed)
            pl.BlockSpec((n_input, hidden), lambda i: (0, 0)),   # w1 (resident)
            pl.BlockSpec((1, hidden), lambda i: (0, 0)),         # b1
            pl.BlockSpec((hidden, hidden), lambda i: (0, 0)),    # w2
            pl.BlockSpec((1, hidden), lambda i: (0, 0)),         # b2
            pl.BlockSpec((hidden, n_output), lambda i: (0, 0)),  # w3
            pl.BlockSpec((1, n_output), lambda i: (0, 0)),       # b3
        ],
        out_specs=pl.BlockSpec((tb, n_output), lambda i: (i, 0)),
        compiler_params=pltpu.CompilerParams(
            dimension_semantics=("parallel",),    # batch tiles shard across v7x's 2 TCs
            vmem_limit_bytes=32 << 20,            # tiny un-padded working set; safe on v7x
        ),
        cost_estimate=pl.CostEstimate(
            flops=flops, transcendentals=0, bytes_accessed=bytes_accessed
        ),
    )(x_in, w1, b1, w2, b2, w3, b3)

    return out if batch_pad == batch else out[:batch]


def init_qnetwork2_params(key, n_input, n_output, hidden=128):
    """Deterministic init matching nn.Linear's default U(-1/sqrt(fan_in), 1/sqrt(fan_in))."""
    ks = jax.random.split(key, 6)

    def linear(kw, kb, fan_in, fan_out):
        bound = 1.0 / jnp.sqrt(jnp.float32(fan_in))
        w = jax.random.uniform(kw, (fan_in, fan_out), jnp.float32, -bound, bound)
        b = jax.random.uniform(kb, (1, fan_out), jnp.float32, -bound, bound)
        return w, b

    w1, b1 = linear(ks[0], ks[1], n_input, hidden)
    w2, b2 = linear(ks[2], ks[3], hidden, hidden)
    w3, b3 = linear(ks[4], ks[5], hidden, n_output)
    return w1, b1, w2, b2, w3, b3


def _ref_forward(x, w1, b1, w2, b2, w3, b3):
    h1 = jnp.maximum(x @ w1 + b1, 0.0)
    h2 = jnp.maximum(h1 @ w2 + b2, 0.0)
    return h2 @ w3 + b3


if __name__ == "__main__":
    # CartPole-like shapes: obs dim 4, 2 actions.
    n_input, n_output = 4, 2
    key = jax.random.PRNGKey(0)
    k_x, k_p = jax.random.split(key)
    params = init_qnetwork2_params(k_p, n_input, n_output)

    # Small training-style batch.
    batch = 8
    x = jax.random.normal(k_x, (batch, n_input), dtype=jnp.float32)
    q = qnetwork2_forward(x, *params)
    jax.block_until_ready(q)
    q_ref = _ref_forward(x, *params)
    assert q.shape == (batch, n_output)
    assert jnp.allclose(q, q_ref, atol=1e-5, rtol=1e-5)

    # act()-style single observation (odd row count, single full-array block).
    x1 = jax.random.normal(jax.random.PRNGKey(2), (1, n_input), dtype=jnp.float32)
    q1 = qnetwork2_forward(x1, *params)
    jax.block_until_ready(q1)
    assert q1.shape == (1, n_output)
    assert jnp.allclose(q1, _ref_forward(x1, *params), atol=1e-5, rtol=1e-5)
    assert int(jnp.argmax(q1)) == int(jnp.argmax(_ref_forward(x1, *params)))

    # Large multi-tile batch exercising the cdiv grid + ragged last block.
    big = 600
    xb = jax.random.normal(jax.random.PRNGKey(1), (big, n_input), dtype=jnp.float32)
    qb = qnetwork2_forward(xb, *params)
    jax.block_until_ready(qb)
    assert qb.shape == (big, n_output)
    assert jnp.allclose(qb, _ref_forward(xb, *params), atol=1e-4, rtol=1e-5)

    print("KERNEL_OK")
</pallas_src>

<mosaic_0001>
module attributes {stable_mosaic.version = 11 : i64} {
  func.func @_mlp_kernel(%arg0: i32, %arg1: memref<8x4xf32, #tpu.memory_space<vmem>>, %arg2: memref<4x128xf32, #tpu.memory_space<vmem>>, %arg3: memref<1x128xf32, #tpu.memory_space<vmem>>, %arg4: memref<128x128xf32, #tpu.memory_space<vmem>>, %arg5: memref<1x128xf32, #tpu.memory_space<vmem>>, %arg6: memref<128x2xf32, #tpu.memory_space<vmem>>, %arg7: memref<1x2xf32, #tpu.memory_space<vmem>>, %arg8: memref<8x2xf32, #tpu.memory_space<vmem>>) attributes {dimension_semantics = [#tpu.dimension_semantics<parallel>], iteration_bounds = array<i64: 1>, scalar_prefetch = 0 : i64, scratch_operands = 0 : i64, tpu.core_type = #tpu.core_type<tc>, window_params = [{transform_indices = @transform_0, window_bounds = array<i64: 8, 4>}, {pipeline_mode = #tpu.pipeline_mode<synchronous>, transform_indices = @transform_1, window_bounds = array<i64: 4, 128>}, {pipeline_mode = #tpu.pipeline_mode<synchronous>, transform_indices = @transform_2, window_bounds = array<i64: 1, 128>}, {pipeline_mode = #tpu.pipeline_mode<synchronous>, transform_indices = @transform_3, window_bounds = array<i64: 128, 128>}, {pipeline_mode = #tpu.pipeline_mode<synchronous>, transform_indices = @transform_4, window_bounds = array<i64: 1, 128>}, {pipeline_mode = #tpu.pipeline_mode<synchronous>, transform_indices = @transform_5, window_bounds = array<i64: 128, 2>}, {pipeline_mode = #tpu.pipeline_mode<synchronous>, transform_indices = @transform_6, window_bounds = array<i64: 1, 2>}, {transform_indices = @transform_7, window_bounds = array<i64: 8, 2>}]} {
    %c0 = arith.constant 0 : index
    %c0_0 = arith.constant 0 : index
    %0 = vector.load %arg1[%c0, %c0_0] : memref<8x4xf32, #tpu.memory_space<vmem>>, vector<8x4xf32>
    %c0_1 = arith.constant 0 : index
    %c0_2 = arith.constant 0 : index
    %1 = vector.load %arg2[%c0_1, %c0_2] : memref<4x128xf32, #tpu.memory_space<vmem>>, vector<4x128xf32>
    %cst = arith.constant dense<0.000000e+00> : vector<8x128xf32>
    %2 = tpu.matmul %0, %1, %cst {dimension_numbers = #tpu.dot_dimension_numbers<[1], [0], [0], [1], [0, 0, 1, 1], [], []>} : vector<8x4xf32>, vector<4x128xf32>, vector<8x128xf32> -> vector<8x128xf32>
    %c0_3 = arith.constant 0 : index
    %c0_4 = arith.constant 0 : index
    %3 = vector.load %arg3[%c0_3, %c0_4] : memref<1x128xf32, #tpu.memory_space<vmem>>, vector<1x128xf32>
    %4 = vector.broadcast %3 : vector<1x128xf32> to vector<8x128xf32>
    %5 = arith.addf %2, %4 : vector<8x128xf32>
    %cst_5 = arith.constant 0.000000e+00 : f32
    %6 = vector.broadcast %cst_5 : f32 to vector<8x128xf32>
    %7 = arith.maximumf %5, %6 : vector<8x128xf32>
    %c0_6 = arith.constant 0 : index
    %c0_7 = arith.constant 0 : index
    %8 = vector.load %arg4[%c0_6, %c0_7] : memref<128x128xf32, #tpu.memory_space<vmem>>, vector<128x128xf32>
    %cst_8 = arith.constant dense<0.000000e+00> : vector<8x128xf32>
    %9 = tpu.matmul %7, %8, %cst_8 {dimension_numbers = #tpu.dot_dimension_numbers<[1], [0], [0], [1], [0, 0, 1, 1], [], []>} : vector<8x128xf32>, vector<128x128xf32>, vector<8x128xf32> -> vector<8x128xf32>
    %c0_9 = arith.constant 0 : index
    %c0_10 = arith.constant 0 : index
    %10 = vector.load %arg5[%c0_9, %c0_10] : memref<1x128xf32, #tpu.memory_space<vmem>>, vector<1x128xf32>
    %11 = vector.broadcast %10 : vector<1x128xf32> to vector<8x128xf32>
    %12 = arith.addf %9, %11 : vector<8x128xf32>
    %cst_11 = arith.constant 0.000000e+00 : f32
    %13 = vector.broadcast %cst_11 : f32 to vector<8x128xf32>
    %14 = arith.maximumf %12, %13 : vector<8x128xf32>
    %c0_12 = arith.constant 0 : index
    %c0_13 = arith.constant 0 : index
    %15 = vector.load %arg6[%c0_12, %c0_13] : memref<128x2xf32, #tpu.memory_space<vmem>>, vector<128x2xf32>
    %cst_14 = arith.constant dense<0.000000e+00> : vector<8x2xf32>
    %16 = tpu.matmul %14, %15, %cst_14 {dimension_numbers = #tpu.dot_dimension_numbers<[1], [0], [0], [1], [0, 0, 1, 1], [], []>} : vector<8x128xf32>, vector<128x2xf32>, vector<8x2xf32> -> vector<8x2xf32>
    %c0_15 = arith.constant 0 : index
    %c0_16 = arith.constant 0 : index
    %17 = vector.load %arg7[%c0_15, %c0_16] : memref<1x2xf32, #tpu.memory_space<vmem>>, vector<1x2xf32>
    %18 = vector.broadcast %17 : vector<1x2xf32> to vector<8x2xf32>
    %19 = arith.addf %16, %18 : vector<8x2xf32>
    %c0_17 = arith.constant 0 : index
    %c0_18 = arith.constant 0 : index
    %20 = vector.load %arg8[%c0_17, %c0_18] : memref<8x2xf32, #tpu.memory_space<vmem>>, vector<8x2xf32>
    tpu.vector_store %arg8[%c0_17, %c0_18], %19 {strides = array<i32>} : memref<8x2xf32, #tpu.memory_space<vmem>>, vector<8x2xf32>,
    return
  }
  func.func @transform_0(%arg0: i32) -> (i32, i32) {
    %c0_i32 = arith.constant 0 : i32
    %c0_i32_0 = arith.constant 0 : i32
    return %arg0, %c0_i32 : i32, i32
  }
  func.func @transform_1(%arg0: i32) -> (i32, i32) {
    %c0_i32 = arith.constant 0 : i32
    %c0_i32_0 = arith.constant 0 : i32
    %c0_i32_1 = arith.constant 0 : i32
    return %c0_i32, %c0_i32_0 : i32, i32
  }
  func.func @transform_2(%arg0: i32) -> (i32, i32) {
    %c0_i32 = arith.constant 0 : i32
    %c0_i32_0 = arith.constant 0 : i32
    %c0_i32_1 = arith.constant 0 : i32
    return %c0_i32, %c0_i32_0 : i32, i32
  }
  func.func @transform_3(%arg0: i32) -> (i32, i32) {
    %c0_i32 = arith.constant 0 : i32
    %c0_i32_0 = arith.constant 0 : i32
    %c0_i32_1 = arith.constant 0 : i32
    return %c0_i32, %c0_i32_0 : i32, i32
  }
  func.func @transform_4(%arg0: i32) -> (i32, i32) {
    %c0_i32 = arith.constant 0 : i32
    %c0_i32_0 = arith.constant 0 : i32
    %c0_i32_1 = arith.constant 0 : i32
    return %c0_i32, %c0_i32_0 : i32, i32
  }
  func.func @transform_5(%arg0: i32) -> (i32, i32) {
    %c0_i32 = arith.constant 0 : i32
    %c0_i32_0 = arith.constant 0 : i32
    %c0_i32_1 = arith.constant 0 : i32
    return %c0_i32, %c0_i32_0 : i32, i32
  }
  func.func @transform_6(%arg0: i32) -> (i32, i32) {
    %c0_i32 = arith.constant 0 : i32
    %c0_i32_0 = arith.constant 0 : i32
    %c0_i32_1 = arith.constant 0 : i32
    return %c0_i32, %c0_i32_0 : i32, i32
  }
  func.func @transform_7(%arg0: i32) -> (i32, i32) {
    %c0_i32 = arith.constant 0 : i32
    %c0_i32_0 = arith.constant 0 : i32
    return %arg0, %c0_i32 : i32, i32
  }
}

</mosaic_0001>

<bundles_post_ra>
// kernel: qnetwork2_forward.1
= control target key start
LH: loop header
LB: loop body
LE: loop exit
PB: predicated region body
PF: predicated region fallthrough
CT: control target
= control target key end

     0   :  { %vm36_vm0 = vcmask 1043456   ;;  %vm32_vm1 = vcmask 31744   ;;  %vm142_vm2 = vcmask 15360   ;;  %s307_s1 = inlined_call_operand.vmem [shape: f32[4,128], index: 1, kind: input, shape index: {}]   ;;  %s308_s0 = inlined_call_operand.vmem [shape: f32[8,4], index: 0, kind: input, shape index: {}]   ;;  %s309_s3 = inlined_call_operand.vmem [shape: f32[128,128], index: 3, kind: input, shape index: {}]   ;;  %s310_s2 = inlined_call_operand.vmem [shape: f32[1,128], index: 2, kind: input, shape index: {}]   ;;  %s311_s4 = inlined_call_operand.vmem [shape: f32[1,128], index: 4, kind: input, shape index: {}]   ;;  %s312_s5 = inlined_call_operand.vmem [shape: f32[128,2], index: 5, kind: input, shape index: {}]   ;;  %s313_s6 = inlined_call_operand.vmem [shape: f32[1,2], index: 6, kind: input, shape index: {}]   ;;  %s314_s7 = inlined_call_operand.vmem [shape: f32[8,2], index: 7, kind: output, shape index: {}]  }
   0x1   :  { %v27_v0 = vld [vmem:[%s307_s1] sm:$0xf]  ;;  %v76_v2 = vld [vmem:[%s309_s3 + $0x78] sm:$0xff]  ;;  %v75_v3 = vld [vmem:[%s309_s3 + $0x70] sm:$0xff] }
   0x2   :  { %v26_v1 = vld [vmem:[%s308_s0] sm:$0xff]  ;;  %148 = vmatpush.msk.msra.mxu0 %vm36_vm0, %v27_v0  ;;  %81 = vmatpush.msra.mxu1 %v76_v2  ;;  %v74_v4 = vld [vmem:[%s309_s3 + $0x68] sm:$0xff]  ;;  %v72_v6 = vld [vmem:[%s309_s3 + $0x58] sm:$0xff] }
   0x3   :  { %149 = vmatmul.msk.f32.vlgmr.msra.gmra.mxu0 %vm32_vm1, %v26_v1  ;;  %v73_v5 = vld [vmem:[%s309_s3 + $0x60] sm:$0xff]  ;;  %v71_v7 = vld [vmem:[%s309_s3 + $0x50] sm:$0xff]  ;;  %v70_v8 = vld [vmem:[%s309_s3 + $0x48] sm:$0xff] }
   0x4   :  { %82 = vmatpush.msra.mxu1 %v75_v3  ;;  %v69_v9 = vld [vmem:[%s309_s3 + $0x40] sm:$0xff]  ;;  %v68_v10 = vld [vmem:[%s309_s3 + $0x38] sm:$0xff]  ;;  %v67_v11 = vld [vmem:[%s309_s3 + $0x30] sm:$0xff] }
   0x5   :  { %v66_v12 = vld [vmem:[%s309_s3 + $0x28] sm:$0xff]  ;;  %v65_v13 = vld [vmem:[%s309_s3 + $0x20] sm:$0xff]  ;;  %v64_v14 = vld [vmem:[%s309_s3 + $0x18] sm:$0xff] }
   0x6   :  { %83 = vmatpush.msra.mxu1 %v74_v4  ;;  %v63_v15 = vld [vmem:[%s309_s3 + $0x10] sm:$0xff]  ;;  %v62_v16 = vld [vmem:[%s309_s3 + $0x8] sm:$0xff]  ;;  %v61_v17 = vld [vmem:[%s309_s3] sm:$0xff] }
   0x7   :  { %v117_v18 = vld [vmem:[%s312_s5 + $0x78] sm:$0xff]  ;;  %v116_v19 = vld [vmem:[%s312_s5 + $0x70] sm:$0xff]  ;;  %v115_v20 = vld [vmem:[%s312_s5 + $0x68] sm:$0xff] }
   0x8   :  { %84 = vmatpush.msra.mxu1 %v73_v5  ;;  %122 = vmatpush.msra.mxu2 %v117_v18  ;;  %v114_v21 = vld [vmem:[%s312_s5 + $0x60] sm:$0xff]  ;;  %v113_v22 = vld [vmem:[%s312_s5 + $0x58] sm:$0xff]  ;;  %v112_v23 = vld [vmem:[%s312_s5 + $0x50] sm:$0xff] }
   0x9   :  { %v111_v24 = vld [vmem:[%s312_s5 + $0x48] sm:$0xff]  ;;  %v110_v25 = vld [vmem:[%s312_s5 + $0x40] sm:$0xff]  ;;  %v109_v26 = vld [vmem:[%s312_s5 + $0x38] sm:$0xff] }
   0xa   :  { %85 = vmatpush.msra.mxu1 %v72_v6  ;;  %123 = vmatpush.msra.mxu2 %v116_v19  ;;  %v108_v27 = vld [vmem:[%s312_s5 + $0x30] sm:$0xff]  ;;  %v107_v28 = vld [vmem:[%s312_s5 + $0x28] sm:$0xff]  ;;  %v106_v29 = vld [vmem:[%s312_s5 + $0x20] sm:$0xff] }
   0xb   :  { %v105_v30 = vld [vmem:[%s312_s5 + $0x18] sm:$0xff]  ;;  %v150_v31 = vld [vmem:[%s310_s2] ss:$0 sm:$0xff]  ;;  %v104_v35 = vld [vmem:[%s312_s5 + $0x10] sm:$0xff] }
   0xc   :  { %86 = vmatpush.msra.mxu1 %v71_v7  ;;  %124 = vmatpush.msra.mxu2 %v115_v20  ;;  %v103_v36 = vld [vmem:[%s312_s5 + $0x8] sm:$0xff]  ;;  %v102_v37 = vld [vmem:[%s312_s5] sm:$0xff] }
   0xd   :  { %v151_v38 = vld [vmem:[%s311_s4] ss:$0 sm:$0xff] }
   0xe   :  { %87 = vmatpush.msra.mxu1 %v70_v8  ;;  %125 = vmatpush.msra.mxu2 %v114_v21  ;;  %v152_v42 = vld [vmem:[%s313_s6] ss:$0 sm:$0xff] }
  0x10   :  { %88 = vmatpush.msra.mxu1 %v69_v9  ;;  %126 = vmatpush.msra.mxu2 %v113_v22 }
  0x12   :  { %89 = vmatpush.msra.mxu1 %v68_v10  ;;  %127 = vmatpush.msra.mxu2 %v112_v23 }
  0x14   :  { %90 = vmatpush.msra.mxu1 %v67_v11  ;;  %128 = vmatpush.msra.mxu2 %v111_v24 }
  0x16   :  { %91 = vmatpush.msra.mxu1 %v66_v12  ;;  %129 = vmatpush.msra.mxu2 %v110_v25 }
  0x18   :  { %92 = vmatpush.msra.mxu1 %v65_v13  ;;  %130 = vmatpush.msra.mxu2 %v109_v26 }
  0x1a   :  { %93 = vmatpush.msra.mxu1 %v64_v14  ;;  %131 = vmatpush.msra.mxu2 %v108_v27 }
  0x1c   :  { %94 = vmatpush.msra.mxu1 %v63_v15  ;;  %132 = vmatpush.msra.mxu2 %v107_v28 }
  0x1e   :  { %95 = vmatpush.msra.mxu1 %v62_v16  ;;  %133 = vmatpush.msra.mxu2 %v106_v29 }
  0x20   :  { %96 = vmatpush.msra.mxu1 %v61_v17  ;;  %134 = vmatpush.msra.mxu2 %v105_v30 }
  0x22   :  { %135 = vmatpush.msra.mxu2 %v104_v35 }
  0x24   :  { %136 = vmatpush.msra.mxu2 %v103_v36 }
  0x26   :  { %137 = vmatpush.msra.mxu2 %v102_v37 }
  0x80   :  { %v57_v32 = vpop.f32.mrf.mxu0 }
  0x81   :  { %v58_v33 = vadd.f32 %v150_v31, %v57_v32 }
  0x83   :  { %v60_v34 = vmax.f32 %v58_v33, 0.0 }
  0x85   :  { %97 = vmatmul.f32.vlgmr.msra.gmra.mxu1 %v60_v34 }
 0x102   :  { %v98_v39 = vpop.f32.mrf.mxu1 }
 0x103   :  { %v99_v40 = vadd.f32 %v151_v38, %v98_v39 }
 0x105   :  { %v101_v41 = vmax.f32 %v99_v40, 0.0 }
 0x107   :  { %138 = vmatmul.f32.vlgmr.msra.gmra.mxu2 %v101_v41 }
 0x18a   :  { %v139_v43 = vpop.f32.mrf.mxu2 }
 0x18b   :  { %v140_v44 = vadd.f32 %v152_v42, %v139_v43 }
 0x18d   :  { %143 = vst.msk [vmem:[%s314_s7] sm:$0xff] %vm142_vm2, %v140_v44 }

</bundles_post_ra>
